<compile_context>
chip_gen: v6e
topology: v6e:2x2x1
jax: 0.10.0
libtpu: 0.0.40
codegen_flags: <defaults>
</compile_context>

<pallas_src>
import jax
import jax.numpy as jnp
from jax.experimental import pallas as pl
from jax.experimental.pallas import tpu as pltpu


def _three_way_kernel(slab_ref, xi_ref, v_ref, tile_ref, wvrep_ref, bv_ref,
                      wm_slab_ref, wm_xi_ref, bm_ref, hvec_ref, hmat_ref):
    slab = slab_ref[...]          # (tm, 2*d*d)  [xm1_flat | xp1_flat], lane-dense
    xi = xi_ref[...]              # (tm, d*d)    centre matrix, flattened
    v = v_ref[...]                # (tm, d)      centre vector

    # Replicate v across the 2*d*d lanes (vtile[m, c] = v[m, c % d]) via a tiny
    # 0/1 matmul -- a guaranteed-lowering alternative to an in-kernel lane tile.
    vtile = jnp.dot(v, tile_ref[...], preferred_element_type=jnp.float32)

    # Fused batched mat-vec + lin_vec:
    #   h_vec[m,o] = sum_{j,k} xm1[m,j,k] v[m,k] Wv[o,j]
    #              + sum_{j,k} xp1[m,j,k] v[m,k] Wv[o,d+j] + bv[o]
    #             = (slab * vtile) @ Wv_rep + bv
    hv = jnp.dot(slab * vtile, wvrep_ref[...],
                 preferred_element_type=jnp.float32) + bv_ref[...]
    hvec_ref[...] = jnp.tanh(hv).astype(hvec_ref.dtype)

    # lin_mat on [xm1 | xi | xp1]: two accumulated MXU matmuls against the
    # pre-split W_mat (no duplicated (M, 3*d*d) HBM input).
    hm = (jnp.dot(slab, wm_slab_ref[...], preferred_element_type=jnp.float32)
          + jnp.dot(xi, wm_xi_ref[...], preferred_element_type=jnp.float32)
          + bm_ref[...])
    # Outputs are stored at their natural widths (d and d*d lanes).  Packing
    # them to 128-wide stores would need an in-kernel sublane->lane relayout;
    # the kernel is HBM-DMA bound, so the masked stores are not the bottleneck.
    hmat_ref[...] = jnp.tanh(hm).astype(hmat_ref.dtype)


def three_way_mv_composition(x_vec, x_mat, w_vec, b_vec, w_mat, b_mat, *, tm=1024):
    """x_vec: [B, N, d], x_mat: [B, N, d, d]; w_vec: [d, 2d] (torch layout),
    w_mat: [d*d, 3*d*d] (torch layout). Returns (h_vec [B,N,d], h_mat [B,N,d,d])."""
    B, N, d = x_vec.shape
    dd = d * d
    M = B * N
    dtype = x_vec.dtype

    # ---- glue: build the lane-dense neighbour slab [xm1 | xp1] directly ----
    # (identity-matrix padding only affects the neighbours; the centre matrix /
    #  vector are just x_mat / x_vec, so no zero-padding is materialized)
    xm_flat = x_mat.reshape(B, N, dd)
    eye_flat = jnp.broadcast_to(jnp.eye(d, dtype=x_mat.dtype).reshape(1, 1, dd),
                                (B, 1, dd))
    xm1 = jnp.concatenate([eye_flat, xm_flat[:, :N - 1]], axis=1)    # previous
    xp1 = jnp.concatenate([xm_flat[:, 1:], eye_flat], axis=1)        # next
    slab = jnp.concatenate([xm1, xp1], axis=-1).reshape(M, 2 * dd)   # (M, 2*d*d)
    xi = xm_flat.reshape(M, dd)                                      # centre matrix
    v = x_vec.reshape(M, d)                                          # centre vector

    # ---- row tiling: multiples of 8 sublanes; big tiles amortize the ~0.35us
    #      per-grid-step overhead; VMEM footprint at tm=1024 is only ~2.5 MiB,
    #      well inside v5e/v6e/v7x scoped-VMEM defaults ----
    M8 = -(-M // 8) * 8
    if M8 <= tm:
        tm = M8
        M_pad = M8
    else:
        tm = -(-tm // 8) * 8
        M_pad = -(-M // tm) * tm
    pad = M_pad - M
    if pad:
        slab = jnp.pad(slab, ((0, pad), (0, 0)))
        xi = jnp.pad(xi, ((0, pad), (0, 0)))
        v = jnp.pad(v, ((0, pad), (0, 0)))

    # ---- weight pre-arrangement (torch layout -> kernel layout) ----
    # Wv_rep[j*d+k, o] = w_vec[o, j];  Wv_rep[dd + j*d+k, o] = w_vec[o, d+j]
    wv_rep = jnp.repeat(w_vec.T, d, axis=0)                    # (2*d*d, d)
    # lane-replication matrix: tile_mat[k, c] = 1 iff c % d == k
    tile_mat = jnp.tile(jnp.eye(d, dtype=dtype), (1, 2 * d))   # (d, 2*d*d)
    wmT = w_mat.T                                              # (3*d*d, d*d)
    wm_slab = jnp.concatenate([wmT[:dd], wmT[2 * dd:]], axis=0)  # rows for xm1|xp1
    wm_xi = wmT[dd:2 * dd]                                     # rows for xi
    bv = b_vec[None, :]
    bm = b_mat[None, :]

    grid = (M_pad // tm,)

    hvec, hmat = pl.pallas_call(
        _three_way_kernel,
        out_shape=(jax.ShapeDtypeStruct((M_pad, d), dtype),
                   jax.ShapeDtypeStruct((M_pad, dd), dtype)),
        grid_spec=pltpu.PrefetchScalarGridSpec(
            num_scalar_prefetch=0,
            grid=grid,
            in_specs=[
                pl.BlockSpec((tm, 2 * dd), lambda i: (i, 0)),    # fused slab
                pl.BlockSpec((tm, dd), lambda i: (i, 0)),        # centre matrix
                pl.BlockSpec((tm, d), lambda i: (i, 0)),         # centre vector
                pl.BlockSpec((d, 2 * dd), lambda i: (0, 0)),     # lane-tile matrix
                pl.BlockSpec((2 * dd, d), lambda i: (0, 0)),     # Wv (row-replicated)
                pl.BlockSpec((1, d), lambda i: (0, 0)),          # bv
                pl.BlockSpec((2 * dd, dd), lambda i: (0, 0)),    # Wm third for xm1|xp1
                pl.BlockSpec((dd, dd), lambda i: (0, 0)),        # Wm third for xi
                pl.BlockSpec((1, dd), lambda i: (0, 0)),         # bm
            ],
            out_specs=[
                pl.BlockSpec((tm, d), lambda i: (i, 0)),
                pl.BlockSpec((tm, dd), lambda i: (i, 0)),
            ],
        ),
        compiler_params=pltpu.CompilerParams(
            dimension_semantics=("parallel",)),
    )(slab, xi, v, tile_mat, wv_rep, bv, wm_slab, wm_xi, bm)

    h_vec = hvec[:M].reshape(B, N, d)
    h_mat = hmat[:M].reshape(B, N, d, d)
    return h_vec, h_mat


def reference(x_vec, x_mat, w_vec, b_vec, w_mat, b_mat):
    """Pure-JAX replica of the PyTorch forward (tanh / tanh activations)."""
    B, N, d = x_vec.shape
    zeros = jnp.zeros((B, 1, d), x_vec.dtype)
    eye = jnp.broadcast_to(jnp.eye(d, dtype=x_mat.dtype), (B, 1, d, d))
    xv = jnp.concatenate([zeros, x_vec, zeros], axis=1)
    xm = jnp.concatenate([eye, x_mat, eye], axis=1)
    xi_vec = xv[:, 1:N + 1][..., None]                           # (B,N,d,1)
    xim1, xi, xip1 = xm[:, 0:N], xm[:, 1:N + 1], xm[:, 2:N + 2]
    h_vec = jnp.concatenate([xim1 @ xi_vec, xip1 @ xi_vec], axis=-2)[..., 0]
    h_mat = jnp.concatenate([xim1.reshape(B, N, d * d),
                             xi.reshape(B, N, d * d),
                             xip1.reshape(B, N, d * d)], axis=-1)
    h_vec = jnp.tanh(h_vec @ w_vec.T + b_vec)
    h_mat = jnp.tanh(h_mat @ w_mat.T + b_mat).reshape(B, N, d, d)
    return h_vec, h_mat


if __name__ == "__main__":
    d = 8
    B, N = 2, 8

    key = jax.random.PRNGKey(0)
    k1, k2, k3, k4, k5, k6 = jax.random.split(key, 6)
    x_vec = jax.random.normal(k1, (B, N, d), jnp.float32)
    x_mat = jax.random.normal(k2, (B, N, d, d), jnp.float32)

    # deterministic PyTorch-Linear-style init: U(-1/sqrt(fan_in), 1/sqrt(fan_in))
    w_vec = jax.random.uniform(k3, (d, 2 * d), jnp.float32, -1.0, 1.0) / jnp.sqrt(2.0 * d)
    b_vec = jax.random.uniform(k4, (d,), jnp.float32, -1.0, 1.0) / jnp.sqrt(2.0 * d)
    w_mat = jax.random.uniform(k5, (d * d, 3 * d * d), jnp.float32, -1.0, 1.0) / jnp.sqrt(3.0 * d * d)
    b_mat = jax.random.uniform(k6, (d * d,), jnp.float32, -1.0, 1.0) / jnp.sqrt(3.0 * d * d)

    h_vec, h_mat = three_way_mv_composition(x_vec, x_mat, w_vec, b_vec, w_mat, b_mat)
    jax.block_until_ready((h_vec, h_mat))

    rv, rm = reference(x_vec, x_mat, w_vec, b_vec, w_mat, b_mat)
    assert h_vec.shape == (B, N, d) and h_mat.shape == (B, N, d, d)
    assert jnp.allclose(h_vec, rv, atol=2e-5, rtol=2e-5), "h_vec mismatch"
    assert jnp.allclose(h_mat, rm, atol=2e-5, rtol=2e-5), "h_mat mismatch"
    print("KERNEL_OK")
</pallas_src>

<mosaic_0001>
module attributes {stable_mosaic.version = 11 : i64} {
  func.func @_three_way_kernel(%arg0: i32, %arg1: memref<16x128xf32, #tpu.memory_space<vmem>>, %arg2: memref<16x64xf32, #tpu.memory_space<vmem>>, %arg3: memref<16x8xf32, #tpu.memory_space<vmem>>, %arg4: memref<8x128xf32, #tpu.memory_space<vmem>>, %arg5: memref<128x8xf32, #tpu.memory_space<vmem>>, %arg6: memref<1x8xf32, #tpu.memory_space<vmem>>, %arg7: memref<128x64xf32, #tpu.memory_space<vmem>>, %arg8: memref<64x64xf32, #tpu.memory_space<vmem>>, %arg9: memref<1x64xf32, #tpu.memory_space<vmem>>, %arg10: memref<16x8xf32, #tpu.memory_space<vmem>>, %arg11: memref<16x64xf32, #tpu.memory_space<vmem>>) attributes {dimension_semantics = [#tpu.dimension_semantics<parallel>], iteration_bounds = array<i64: 1>, scalar_prefetch = 0 : i64, scratch_operands = 0 : i64, tpu.core_type = #tpu.core_type<tc>, window_params = [{transform_indices = @transform_0, window_bounds = array<i64: 16, 128>}, {transform_indices = @transform_1, window_bounds = array<i64: 16, 64>}, {transform_indices = @transform_2, window_bounds = array<i64: 16, 8>}, {pipeline_mode = #tpu.pipeline_mode<synchronous>, transform_indices = @transform_3, window_bounds = array<i64: 8, 128>}, {pipeline_mode = #tpu.pipeline_mode<synchronous>, transform_indices = @transform_4, window_bounds = array<i64: 128, 8>}, {pipeline_mode = #tpu.pipeline_mode<synchronous>, transform_indices = @transform_5, window_bounds = array<i64: 1, 8>}, {pipeline_mode = #tpu.pipeline_mode<synchronous>, transform_indices = @transform_6, window_bounds = array<i64: 128, 64>}, {pipeline_mode = #tpu.pipeline_mode<synchronous>, transform_indices = @transform_7, window_bounds = array<i64: 64, 64>}, {pipeline_mode = #tpu.pipeline_mode<synchronous>, transform_indices = @transform_8, window_bounds = array<i64: 1, 64>}, {transform_indices = @transform_9, window_bounds = array<i64: 16, 8>}, {transform_indices = @transform_10, window_bounds = array<i64: 16, 64>}]} {
    %c0 = arith.constant 0 : index
    %c0_0 = arith.constant 0 : index
    %0 = vector.load %arg1[%c0, %c0_0] : memref<16x128xf32, #tpu.memory_space<vmem>>, vector<16x128xf32>
    %c0_1 = arith.constant 0 : index
    %c0_2 = arith.constant 0 : index
    %1 = vector.load %arg2[%c0_1, %c0_2] : memref<16x64xf32, #tpu.memory_space<vmem>>, vector<16x64xf32>
    %c0_3 = arith.constant 0 : index
    %c0_4 = arith.constant 0 : index
    %2 = vector.load %arg3[%c0_3, %c0_4] : memref<16x8xf32, #tpu.memory_space<vmem>>, vector<16x8xf32>
    %c0_5 = arith.constant 0 : index
    %c0_6 = arith.constant 0 : index
    %3 = vector.load %arg4[%c0_5, %c0_6] : memref<8x128xf32, #tpu.memory_space<vmem>>, vector<8x128xf32>
    %cst = arith.constant dense<0.000000e+00> : vector<16x128xf32>
    %4 = tpu.matmul %2, %3, %cst {dimension_numbers = #tpu.dot_dimension_numbers<[1], [0], [0], [1], [0, 0, 1, 1], [], []>} : vector<16x8xf32>, vector<8x128xf32>, vector<16x128xf32> -> vector<16x128xf32>
    %5 = arith.mulf %0, %4 : vector<16x128xf32>
    %c0_7 = arith.constant 0 : index
    %c0_8 = arith.constant 0 : index
    %6 = vector.load %arg5[%c0_7, %c0_8] : memref<128x8xf32, #tpu.memory_space<vmem>>, vector<128x8xf32>
    %cst_9 = arith.constant dense<0.000000e+00> : vector<16x8xf32>
    %7 = tpu.matmul %5, %6, %cst_9 {dimension_numbers = #tpu.dot_dimension_numbers<[1], [0], [0], [1], [0, 0, 1, 1], [], []>} : vector<16x128xf32>, vector<128x8xf32>, vector<16x8xf32> -> vector<16x8xf32>
    %c0_10 = arith.constant 0 : index
    %c0_11 = arith.constant 0 : index
    %8 = vector.load %arg6[%c0_10, %c0_11] : memref<1x8xf32, #tpu.memory_space<vmem>>, vector<1x8xf32>
    %9 = vector.broadcast %8 : vector<1x8xf32> to vector<16x8xf32>
    %10 = arith.addf %7, %9 : vector<16x8xf32>
    %11 = math.tanh %10 : vector<16x8xf32>
    %c0_12 = arith.constant 0 : index
    %c0_13 = arith.constant 0 : index
    %12 = vector.load %arg10[%c0_12, %c0_13] : memref<16x8xf32, #tpu.memory_space<vmem>>, vector<16x8xf32>
    tpu.vector_store %arg10[%c0_12, %c0_13], %11 {strides = array<i32>} : memref<16x8xf32, #tpu.memory_space<vmem>>, vector<16x8xf32>,
    %c0_14 = arith.constant 0 : index
    %c0_15 = arith.constant 0 : index
    %13 = vector.load %arg7[%c0_14, %c0_15] : memref<128x64xf32, #tpu.memory_space<vmem>>, vector<128x64xf32>
    %cst_16 = arith.constant dense<0.000000e+00> : vector<16x64xf32>
    %14 = tpu.matmul %0, %13, %cst_16 {dimension_numbers = #tpu.dot_dimension_numbers<[1], [0], [0], [1], [0, 0, 1, 1], [], []>} : vector<16x128xf32>, vector<128x64xf32>, vector<16x64xf32> -> vector<16x64xf32>
    %c0_17 = arith.constant 0 : index
    %c0_18 = arith.constant 0 : index
    %15 = vector.load %arg8[%c0_17, %c0_18] : memref<64x64xf32, #tpu.memory_space<vmem>>, vector<64x64xf32>
    %cst_19 = arith.constant dense<0.000000e+00> : vector<16x64xf32>
    %16 = tpu.matmul %1, %15, %cst_19 {dimension_numbers = #tpu.dot_dimension_numbers<[1], [0], [0], [1], [0, 0, 1, 1], [], []>} : vector<16x64xf32>, vector<64x64xf32>, vector<16x64xf32> -> vector<16x64xf32>
    %17 = arith.addf %14, %16 : vector<16x64xf32>
    %c0_20 = arith.constant 0 : index
    %c0_21 = arith.constant 0 : index
    %18 = vector.load %arg9[%c0_20, %c0_21] : memref<1x64xf32, #tpu.memory_space<vmem>>, vector<1x64xf32>
    %19 = vector.broadcast %18 : vector<1x64xf32> to vector<16x64xf32>
    %20 = arith.addf %17, %19 : vector<16x64xf32>
    %21 = math.tanh %20 : vector<16x64xf32>
    %c0_22 = arith.constant 0 : index
    %c0_23 = arith.constant 0 : index
    %22 = vector.load %arg11[%c0_22, %c0_23] : memref<16x64xf32, #tpu.memory_space<vmem>>, vector<16x64xf32>
    tpu.vector_store %arg11[%c0_22, %c0_23], %21 {strides = array<i32>} : memref<16x64xf32, #tpu.memory_space<vmem>>, vector<16x64xf32>,
    return
  }
  func.func @transform_0(%arg0: i32) -> (i32, i32) {
    %c0_i32 = arith.constant 0 : i32
    %c0_i32_0 = arith.constant 0 : i32
    return %arg0, %c0_i32 : i32, i32
  }
  func.func @transform_1(%arg0: i32) -> (i32, i32) {
    %c0_i32 = arith.constant 0 : i32
    %c0_i32_0 = arith.constant 0 : i32
    return %arg0, %c0_i32 : i32, i32
  }
  func.func @transform_2(%arg0: i32) -> (i32, i32) {
    %c0_i32 = arith.constant 0 : i32
    %c0_i32_0 = arith.constant 0 : i32
    return %arg0, %c0_i32 : i32, i32
  }
  func.func @transform_3(%arg0: i32) -> (i32, i32) {
    %c0_i32 = arith.constant 0 : i32
    %c0_i32_0 = arith.constant 0 : i32
    %c0_i32_1 = arith.constant 0 : i32
    return %c0_i32, %c0_i32_0 : i32, i32
  }
  func.func @transform_4(%arg0: i32) -> (i32, i32) {
    %c0_i32 = arith.constant 0 : i32
    %c0_i32_0 = arith.constant 0 : i32
    %c0_i32_1 = arith.constant 0 : i32
    return %c0_i32, %c0_i32_0 : i32, i32
  }
  func.func @transform_5(%arg0: i32) -> (i32, i32) {
    %c0_i32 = arith.constant 0 : i32
    %c0_i32_0 = arith.constant 0 : i32
    %c0_i32_1 = arith.constant 0 : i32
    return %c0_i32, %c0_i32_0 : i32, i32
  }
  func.func @transform_6(%arg0: i32) -> (i32, i32) {
    %c0_i32 = arith.constant 0 : i32
    %c0_i32_0 = arith.constant 0 : i32
    %c0_i32_1 = arith.constant 0 : i32
    return %c0_i32, %c0_i32_0 : i32, i32
  }
  func.func @transform_7(%arg0: i32) -> (i32, i32) {
    %c0_i32 = arith.constant 0 : i32
    %c0_i32_0 = arith.constant 0 : i32
    %c0_i32_1 = arith.constant 0 : i32
    return %c0_i32, %c0_i32_0 : i32, i32
  }
  func.func @transform_8(%arg0: i32) -> (i32, i32) {
    %c0_i32 = arith.constant 0 : i32
    %c0_i32_0 = arith.constant 0 : i32
    %c0_i32_1 = arith.constant 0 : i32
    return %c0_i32, %c0_i32_0 : i32, i32
  }
  func.func @transform_9(%arg0: i32) -> (i32, i32) {
    %c0_i32 = arith.constant 0 : i32
    %c0_i32_0 = arith.constant 0 : i32
    return %arg0, %c0_i32 : i32, i32
  }
  func.func @transform_10(%arg0: i32) -> (i32, i32) {
    %c0_i32 = arith.constant 0 : i32
    %c0_i32_0 = arith.constant 0 : i32
    return %arg0, %c0_i32 : i32, i32
  }
}

</mosaic_0001>

<bundles_post_ra>
// kernel: tpu_custom_call.1
= control target key start
LH: loop header
LB: loop body
LE: loop exit
PB: predicated region body
PF: predicated region fallthrough
CT: control target
= control target key end

     0   :  { %vm42_vm0 = vcmask 64512   ;;  %vm252_vm1 = vcmask 523264   ;;  %s850_s0 = inlined_call_operand.vmem [shape: f32[16,128], index: 0, kind: input, shape index: {}]   ;;  %s851_s1 = inlined_call_operand.vmem [shape: f32[16,64], index: 1, kind: input, shape index: {}]   ;;  %s852_s2 = inlined_call_operand.vmem [shape: f32[16,8], index: 2, kind: input, shape index: {}]   ;;  %s853_s3 = inlined_call_operand.vmem [shape: f32[8,128], index: 3, kind: input, shape index: {}]   ;;  %s854_s4 = inlined_call_operand.vmem [shape: f32[128,8], index: 4, kind: input, shape index: {}]   ;;  %s855_s5 = inlined_call_operand.vmem [shape: f32[1,8], index: 5, kind: input, shape index: {}]   ;;  %s856_s6 = inlined_call_operand.vmem [shape: f32[128,64], index: 6, kind: input, shape index: {}]   ;;  %s857_s7 = inlined_call_operand.vmem [shape: f32[64,64], index: 7, kind: input, shape index: {}]   ;;  %s858_s8 = inlined_call_operand.vmem [shape: f32[1,64], index: 8, kind: input, shape index: {}]   ;;  %s859_s9 = inlined_call_operand.vmem [shape: f32[16,8], index: 9, kind: output, shape index: {0}]   ;;  %s860_s10 = inlined_call_operand.hbm [shape: f32[16,64], index: 10, kind: output, shape index: {1}]  }
   0x1   :  { %v41_v0 = vld [vmem:[%s853_s3] sm:$0xff]  ;;  %v40_v2 = vld [vmem:[%s852_s2 + $0x8] sm:$0xff]  ;;  %v251_v3 = vld [vmem:[%s857_s7 + $0x38] sm:$0xff] }
   0x2   :  { %v39_v1 = vld [vmem:[%s852_s2] sm:$0xff]  ;;  %497 = vmatprep.subr.mxu1 %v41_v0  ;;  %v250_v4 = vld [vmem:[%s857_s7 + $0x30] sm:$0xff]  ;;  %537 = vmatprep.subr.mxu0 %v251_v3  ;;  %v249_v5 = vld [vmem:[%s857_s7 + $0x28] sm:$0xff] }
   0x3   :  { %499 = vmatprep.mubr.msk.f32.mxu1 %vm42_vm0, %v39_v1  ;;  %498 = vmatpush3.msra.mxu1 %v41_v0  ;;  %v37_v6 = vld [vmem:[%s851_s1] sm:$0xff]  ;;  %v247_v8 = vld [vmem:[%s857_s7 + $0x18] sm:$0xff]  ;;  %v246_v9 = vld [vmem:[%s857_s7 + $0x10] sm:$0xff] }
   0x4   :  { %500 = vmatmul.mubr.msk.f32.vlgmr.msra.gmra.mxu1 %vm42_vm0, %v40_v2  ;;  %538 = vmatpush3.msra.mxu0 %v251_v3  ;;  %v248_v7 = vld [vmem:[%s857_s7 + $0x20] sm:$0xff]  ;;  %v141_v10 = vld [vmem:[%s854_s4 + $0x78] sm:$0xff]  ;;  %v140_v11 = vld [vmem:[%s854_s4 + $0x70] sm:$0xff] }
   0x5   :  { %539 = vmatprep.subr.mxu0 %v250_v4  ;;  %553 = vmatprep.mubr.msk.f32.mxu0 %vm252_vm1, %v37_v6  ;;  %v245_v12 = vld [vmem:[%s857_s7 + $0x8] sm:$0xff]  ;;  %v244_v14 = vld [vmem:[%s857_s7] sm:$0xff] }
   0x6   :  { %540 = vmatpush3.msra.mxu0 %v250_v4  ;;  %502 = vmatprep.subr.mxu1 %v141_v10  ;;  %v139_v13 = vld [vmem:[%s854_s4 + $0x68] sm:$0xff]  ;;  %v138_v15 = vld [vmem:[%s854_s4 + $0x60] sm:$0xff] }
   0x7   :  { %541 = vmatprep.subr.mxu0 %v249_v5  ;;  %503 = vmatpush3.msra.mxu1 %v141_v10 }
   0x8   :  { %542 = vmatpush3.msra.mxu0 %v249_v5  ;;  %504 = vmatprep.subr.mxu1 %v140_v11 }
   0x9   :  { %543 = vmatprep.subr.mxu0 %v248_v7  ;;  %505 = vmatpush3.msra.mxu1 %v140_v11 }
   0xa   :  { %544 = vmatpush3.msra.mxu0 %v248_v7 }
   0xb   :  { %545 = vmatprep.subr.mxu0 %v247_v8 }
   0xc   :  { %546 = vmatpush3.msra.mxu0 %v247_v8 }
   0xd   :  { %547 = vmatprep.subr.mxu0 %v246_v9 }
   0xe   :  { %548 = vmatpush3.msra.mxu0 %v246_v9 }
   0xf   :  { %549 = vmatprep.subr.mxu0 %v245_v12 }
  0x10   :  { %16 = vsyncpa [#allocation3], 0  ;;  %550 = vmatpush3.msra.mxu0 %v245_v12  ;;  %v243_v16 = vld [vmem:[%s856_s6 + $0x78] sm:$0xff]  ;;  %v38_v17 = vld [vmem:[%s851_s1 + $0x8] sm:$0xff]  ;;  %506 = vmatprep.subr.mxu1 %v139_v13 }
  0x11   :  { %551 = vmatprep.subr.mxu0 %v244_v14  ;;  %v742_v18 = vld [vmem:[%s850_s0] sm:$0xff]  ;;  %507 = vmatpush3.msra.mxu1 %v139_v13  ;;  %v242_v19 = vld [vmem:[%s856_s6 + $0x70] sm:$0xff]  ;;  %v137_v20 = vld [vmem:[%s854_s4 + $0x58] sm:$0xff] }
  0x12   :  { %552 = vmatpush3.msra.mxu0 %v244_v14  ;;  %508 = vmatprep.subr.mxu1 %v138_v15  ;;  %v241_v21 = vld [vmem:[%s856_s6 + $0x68] sm:$0xff]  ;;  %v136_v22 = vld [vmem:[%s854_s4 + $0x50] sm:$0xff]  ;;  %v240_v23 = vld [vmem:[%s856_s6 + $0x60] sm:$0xff] }
  0x13   :  { %556 = vmatprep.subr.mxu0 %v243_v16  ;;  %554 = vmatmul.mubr.msk.f32.vlgmr.msra.gmra.mxu0 %vm252_vm1, %v38_v17  ;;  %v135_v24 = vld [vmem:[%s854_s4 + $0x48] sm:$0xff]  ;;  %v239_v25 = vld [vmem:[%s856_s6 + $0x58] sm:$0xff]  ;;  %v134_v26 = vld [vmem:[%s854_s4 + $0x40] sm:$0xff] }
  0x14   :  { %557 = vmatpush3.msra.mxu0 %v243_v16  ;;  %588 = vmatprep.mubr.f32.mxu0 %v742_v18  ;;  %v238_v27 = vld [vmem:[%s856_s6 + $0x50] sm:$0xff]  ;;  %v133_v28 = vld [vmem:[%s854_s4 + $0x38] sm:$0xff]  ;;  %v237_v29 = vld [vmem:[%s856_s6 + $0x48] sm:$0xff] }
  0x15   :  { %558 = vmatprep.subr.mxu0 %v242_v19  ;;  %509 = vmatpush3.msra.mxu1 %v138_v15  ;;  %v132_v30 = vld [vmem:[%s854_s4 + $0x30] sm:$0xff]  ;;  %v236_v31 = vld [vmem:[%s856_s6 + $0x40] sm:$0xff]  ;;  %v131_v32 = vld [vmem:[%s854_s4 + $0x28] sm:$0xff] }
  0x16   :  { %559 = vmatpush3.msra.mxu0 %v242_v19  ;;  %510 = vmatprep.subr.mxu1 %v137_v20  ;;  %v235_v33 = vld [vmem:[%s856_s6 + $0x38] sm:$0xff]  ;;  %v130_v34 = vld [vmem:[%s854_s4 + $0x20] sm:$0xff]  ;;  %v234_v35 = vld [vmem:[%s856_s6 + $0x30] sm:$0xff] }
  0x17   :  { %560 = vmatprep.subr.mxu0 %v241_v21  ;;  %511 = vmatpush3.msra.mxu1 %v137_v20  ;;  %v129_v36 = vld [vmem:[%s854_s4 + $0x18] sm:$0xff]  ;;  %v233_v37 = vld [vmem:[%s856_s6 + $0x28] sm:$0xff]  ;;  %v232_v38 = vld [vmem:[%s856_s6 + $0x20] sm:$0xff] }
  0x18   :  { %561 = vmatpush3.msra.mxu0 %v241_v21  ;;  %512 = vmatprep.subr.mxu1 %v136_v22  ;;  %v231_v39 = vld [vmem:[%s856_s6 + $0x18] sm:$0xff]  ;;  %v230_v40 = vld [vmem:[%s856_s6 + $0x10] sm:$0xff]  ;;  %v229_v41 = vld [vmem:[%s856_s6 + $0x8] sm:$0xff] }
  0x19   :  { %562 = vmatprep.subr.mxu0 %v240_v23  ;;  %513 = vmatpush3.msra.mxu1 %v136_v22  ;;  %v228_v42 = vld [vmem:[%s856_s6] sm:$0xff]  ;;  %v36_v43 = vld [vmem:[%s850_s0 + $0x8] sm:$0xff]  ;;  %v128_v44 = vld [vmem:[%s854_s4 + $0x10] sm:$0xff] }
  0x1a   :  { %563 = vmatpush3.msra.mxu0 %v240_v23  ;;  %514 = vmatprep.subr.mxu1 %v135_v24  ;;  %v127_v45 = vld [vmem:[%s854_s4 + $0x8] sm:$0xff]  ;;  %v126_v46 = vld [vmem:[%s854_s4] sm:$0xff]  ;;  %s624_s4 = smov [#allocation2]  }
  0x1b   :  { %564 = vmatprep.subr.mxu0 %v239_v25  ;;  %515 = vmatpush3.msra.mxu1 %v135_v24  ;;  %v447_v54 = vld [vmem:[%s858_s8] ss:$0 sm:$0xff]  ;;  %s429_s13 = sshll.u32 %s624_s4, 4  ;;  %s430_s13 = int_to_ptr.vmem [resolvable:$true] %s429_s13 }
  0x1c   :  { %565 = vmatpush3.msra.mxu0 %v239_v25  ;;  %516 = vmatprep.subr.mxu1 %v134_v26  ;;  %s602_s14 = scalar_lea.vmem %s430_s13, 256  ;;  %p607_p1 = scmp.lt.s32.totalorder %s430_s13, %s430_s13 }
  0x1d   :  { %566 = vmatprep.subr.mxu0 %v238_v27  ;;  %517 = vmatpush3.msra.mxu1 %v134_v26  ;;  %p603_p0 = scmp.ne.s32.totalorder %s430_s13, %s602_s14  ;;  %p608_p2 = scmp.lt.s32.totalorder %s602_s14, %s602_s14 }
  0x1e   :  { %567 = vmatpush3.msra.mxu0 %v238_v27  ;;  %518 = vmatprep.subr.mxu1 %v133_v28 }
  0x1f   :  { %568 = vmatprep.subr.mxu0 %v237_v29  ;;  %519 = vmatpush3.msra.mxu1 %v133_v28  ;;  %p609_p3 = por %p608_p2, %p607_p1 }
  0x20   :  { %569 = vmatpush3.msra.mxu0 %v237_v29  ;;  %520 = vmatprep.subr.mxu1 %v132_v30 }
  0x21   :  { %570 = vmatprep.subr.mxu0 %v236_v31  ;;  %521 = vmatpush3.msra.mxu1 %v132_v30  ;;  %p610_p4 = pnand %p609_p3, %p603_p0 }
  0x22   :  { %571 = vmatpush3.msra.mxu0 %v236_v31  ;;  %522 = vmatprep.subr.mxu1 %v131_v32 }
  0x23   :  { %572 = vmatprep.subr.mxu0 %v235_v33  ;;  %523 = vmatpush3.msra.mxu1 %v131_v32 }
  0x24   :  { %573 = vmatpush3.msra.mxu0 %v235_v33  ;;  %524 = vmatprep.subr.mxu1 %v130_v34 }
  0x25   :  { %574 = vmatprep.subr.mxu0 %v234_v35  ;;  %525 = vmatpush3.msra.mxu1 %v130_v34 }
  0x26   :  { %575 = vmatpush3.msra.mxu0 %v234_v35  ;;  %526 = vmatprep.subr.mxu1 %v129_v36 }
  0x27   :  { %576 = vmatprep.subr.mxu0 %v233_v37  ;;  %527 = vmatpush3.msra.mxu1 %v129_v36 }
  0x28   :  { %577 = vmatpush3.msra.mxu0 %v233_v37  ;;  %528 = vmatprep.subr.mxu1 %v128_v44 }
  0x29   :  { %578 = vmatprep.subr.mxu0 %v232_v38  ;;  %529 = vmatpush3.msra.mxu1 %v128_v44 }
  0x2a   :  { %579 = vmatpush3.msra.mxu0 %v232_v38  ;;  %530 = vmatprep.subr.mxu1 %v127_v45 }
  0x2b   :  { %580 = vmatprep.subr.mxu0 %v231_v39  ;;  %531 = vmatpush3.msra.mxu1 %v127_v45 }
  0x2c   :  { %581 = vmatpush3.msra.mxu0 %v231_v39  ;;  %532 = vmatprep.subr.mxu1 %v126_v46 }
  0x2d   :  { %582 = vmatprep.subr.mxu0 %v230_v40  ;;  %533 = vmatpush3.msra.mxu1 %v126_v46 }
  0x2e   :  { %583 = vmatpush3.msra.mxu0 %v230_v40 }
  0x2f   :  { %584 = vmatprep.subr.mxu0 %v229_v41 }
  0x30   :  { %585 = vmatpush3.msra.mxu0 %v229_v41 }
  0x31   :  { %586 = vmatprep.subr.mxu0 %v228_v42 }
  0x32   :  { %587 = vmatpush3.msra.mxu0 %v228_v42 }
  0x33   :  { %589 = vmatmul.mubr.f32.vlgmr.msra.gmra.mxu0 %v36_v43 }
  0xc4   :  { %v501_v47 = vpop.f32.mrf.mxu1 }
  0xc5   :  { %v125_v50 = vmul.f32 %v501_v47, %v36_v43 }
  0xc6   :  { %v115_v48 = vpop.f32.mrf.mxu1 }
  0xc7   :  { %v124_v49 = vmul.f32 %v115_v48, %v742_v18 }
  0xc9   :  { %534 = vmatprep.mubr.f32.mxu1 %v124_v49 }
  0xca   :  { %535 = vmatmul.mubr.f32.vlgmr.msra.gmra.mxu1 %v125_v50 }
  0xd3   :  { %v555_v51 = vpop.f32.mrf.mxu0 }
  0xd5   :  { %v325_v52 = vpop.f32.mrf.mxu0 }
  0xf3   :  { %v590_v53 = vpop.f32.mrf.mxu0 }
  0xf4   :  { %v406_v55 = vadd.f32 %v590_v53, %v555_v51 }
  0xf5   :  { %v400_v56 = vpop.f32.mrf.mxu0 }
  0xf6   :  { %v417_v57 = vadd.f32 %v447_v54, %v406_v55  ;;  %v401_v58 = vadd.f32 %v400_v56, %v325_v52 }
  0xf8   :  { %594 = vtanh.f32 %v417_v57  ;;  %v416_v59 = vadd.f32 %v447_v54, %v401_v58 }
  0xfa   :  { %596 = vtanh.f32 %v416_v59 }
 0x105   :  { %v595_v60 = vpop.eup %594 }
 0x106   :  { %421 = vst.msk [vmem:[#allocation2 + $0x8] sm:$0xff] %vm252_vm1, %v595_v60 }
 0x107   :  { %v597_v61 = vpop.eup %596 }
 0x108   :  { %420 = vst.msk [vmem:[#allocation2] sm:$0xff] %vm252_vm1, %v597_v61 }
 0x109   :  { %613 = shalt.err (!%p610_p4)
}
 0x10a   :  { %s625_s8 = smov 128   ;;  %s626_s15 = smov 8   ;;  %v444_v62 = vld [vmem:[%s855_s5] ss:$0 sm:$0xff] }
 0x10b   :  { %435 = dma.vmem_to_hbm [thread:$0]  %s430_s13, 256, %s860_s10, [#allocation3], %s625_s8, %s625_s8, %s626_s15  }
 0x18a   :  { %v536_v63 = vpop.f32.mrf.mxu1 }
 0x18b   :  { %v221_v0 = vadd.f32 %v536_v63, %v444_v62 }
 0x18c   :  { %v215_v1 = vpop.f32.mrf.mxu1 }
 0x18d   :  { %598 = vtanh.f32 %v221_v0  ;;  %v216_v2 = vadd.f32 %v444_v62, %v215_v1 }
 0x18f   :  { %600 = vtanh.f32 %v216_v2 }
 0x19a   :  { %v599_v3 = vpop.eup %598 }
 0x19b   :  { %227 = vst.msk [vmem:[%s859_s9 + $0x8] sm:$0xff] %vm42_vm0, %v599_v3 }
 0x19c   :  { %v601_v4 = vpop.eup %600 }
 0x19d   :  { %226 = vst.msk [vmem:[%s859_s9] sm:$0xff] %vm42_vm0, %v601_v4 }
 0x19e   :  { %622 = dma.done.wait [#allocation3], 256  }
 0x19f   :  { %623 = vsyncadd [#allocation3], 4294967040 }
 0x1a0   :  { %441 = vsyncpa [#allocation3], 1 }

</bundles_post_ra>
